<compile_context>
chip_gen: v7x
topology: tpu7x:2x2x1
jax: 0.10.0
libtpu: 0.0.40
codegen_flags: <defaults>
</compile_context>

<pallas_src>
import functools

import jax
import jax.numpy as jnp
from jax.experimental import pallas as pl
from jax.experimental.pallas import tpu as pltpu

IN_FEAT = 16                   # Linear in_features
SEQ = 16                       # rows per sample (Linear output squeezes to (B, 16))
PACK = 8                       # batch samples packed per lane-dense output row
LANES = PACK * SEQ             # 128 -> lane-dense output width


def _model_kernel(w_ref, x_ref, bias_ref, o_ref):
    # w_ref   : (16,)           SMEM — Linear weight scalars
    # x_ref   : (16, tbp, 128)  VMEM — feature-major packed x tile
    # bias_ref: (1, 128)        VMEM — tile(arange(1..16) + linear bias, 8)
    # o_ref   : (tbp, 128)      VMEM — lane-dense packed output
    acc = x_ref[0] * w_ref[0]
    # Unrolled 16-step VPU FMA (scalar-from-SMEM * vector); no MXU involved.
    for k in range(1, IN_FEAT):
        acc = acc + x_ref[k] * w_ref[k]
    o_ref[...] = jnp.maximum(acc + bias_ref[...], 0.0)


@functools.partial(jax.jit, static_argnames=("block_rows",))
def model_forward(x1, x2, linear_w, linear_b, add_weights, *, block_rows=512):
    """x1: (B, 16, 16) f32 -> relu(Linear(16->1)(x1).squeeze(-1) + arange(1, 17))."""
    del x2  # unused by the reference forward
    B = x1.shape[0]
    block_rows = max(8, (block_rows // 8) * 8)     # keep tiles (8,128)-aligned

    # ---- tile selection --------------------------------------------------
    n_packed = -(-B // PACK)                       # ceil(B / 8) packed rows
    if n_packed > block_rows:
        tbp = block_rows                           # large batch: 512-row tiles
    elif n_packed >= 32:
        # split into >=2 balanced, 8-aligned tiles so v7x megacore gets both TCs
        half = -(-n_packed // 2)
        tbp = -(-half // 8) * 8
    else:
        tbp = n_packed                             # single full-extent block
    n_grid = -(-n_packed // tbp)
    n_packed_pad = n_grid * tbp
    b_pad = n_packed_pad * PACK

    # ---- host-side layout plumbing (feature-major, lane-dense packing) ----
    x = x1.astype(jnp.float32)
    if b_pad != B:                                 # skip the pad copy when aligned
        x = jnp.pad(x, ((0, b_pad - B), (0, 0), (0, 0)))
    # (B,16,16) -> (feat, B, seq) -> (feat, B/8, 128): lane l = 16*j + s for
    # batch sample 8r+j, seq s.  The trailing reshape is a pure view.
    x_fm = jnp.transpose(x, (2, 0, 1)).reshape(IN_FEAT, n_packed_pad, LANES)

    # Fold Linear bias into the arange additive weights, replicate to 128 lanes.
    bias_row = jnp.tile(add_weights.reshape(1, SEQ).astype(jnp.float32)
                        + linear_b.reshape(1, 1).astype(jnp.float32),
                        (1, PACK))                                     # (1, 128)

    cost = pl.CostEstimate(
        flops=2 * IN_FEAT * n_packed_pad * LANES,
        transcendentals=0,
        bytes_accessed=4 * (IN_FEAT * n_packed_pad * LANES      # x read
                            + n_packed_pad * LANES              # out write
                            + LANES + IN_FEAT))                 # bias + w

    out_packed = pl.pallas_call(
        _model_kernel,
        out_shape=jax.ShapeDtypeStruct((n_packed_pad, LANES), jnp.float32),
        grid_spec=pltpu.PrefetchScalarGridSpec(
            num_scalar_prefetch=0,
            grid=(n_grid,),
            in_specs=[
                pl.BlockSpec(memory_space=pltpu.MemorySpace.SMEM),        # w (16,)
                pl.BlockSpec((IN_FEAT, tbp, LANES), lambda i: (0, i, 0)), # packed x
                pl.BlockSpec((1, LANES), lambda i: (0, 0)),               # fused bias
            ],
            out_specs=pl.BlockSpec((tbp, LANES), lambda i: (i, 0)),
        ),
        compiler_params=pltpu.CompilerParams(
            dimension_semantics=("parallel",)),
        cost_estimate=cost,
    )(linear_w.astype(jnp.float32), x_fm, bias_row)

    # Unpack lane-dense slab back to (B, 16); padded rows are sliced off.
    return out_packed.reshape(b_pad, SEQ)[:B]


if __name__ == "__main__":
    key = jax.random.PRNGKey(0)
    k_x1, k_x2, k_w, k_b = jax.random.split(key, 4)

    B = 3  # mirrors the original x1 batch of 3
    x1 = jax.random.normal(k_x1, (B, SEQ, IN_FEAT), dtype=jnp.float32)
    x2 = jax.random.normal(k_x2, (B, SEQ), dtype=jnp.float32)  # unused, mirrors signature

    # Deterministic params (matches nn.Linear's U(-1/sqrt(16), 1/sqrt(16)) scheme).
    bound = 1.0 / jnp.sqrt(float(IN_FEAT))
    linear_w = jax.random.uniform(k_w, (IN_FEAT,), jnp.float32, -bound, bound)
    linear_b = jax.random.uniform(k_b, (1,), jnp.float32, -bound, bound)
    add_weights = jnp.arange(1.0, 17.0, dtype=jnp.float32)

    out = model_forward(x1, x2, linear_w, linear_b, add_weights)
    jax.block_until_ready(out)

    # Pure-JAX reference of the same semantics.
    o1_ref = jnp.einsum("bik,k->bi", x1, linear_w) + linear_b[0]
    ref = jnp.maximum(o1_ref + add_weights.reshape(1, SEQ), 0.0)
    assert out.shape == (B, SEQ)
    assert jnp.allclose(out, ref, atol=1e-5, rtol=1e-5), "mismatch vs reference"

    print("KERNEL_OK")
</pallas_src>

<mosaic_0001>
module attributes {stable_mosaic.version = 11 : i64} {
  func.func @_model_kernel(%arg0: i32, %arg1: memref<16xf32, #tpu.memory_space<smem>>, %arg2: memref<16x1x128xf32, #tpu.memory_space<vmem>>, %arg3: memref<1x128xf32, #tpu.memory_space<vmem>>, %arg4: memref<1x128xf32, #tpu.memory_space<vmem>>) attributes {dimension_semantics = [#tpu.dimension_semantics<parallel>], iteration_bounds = array<i64: 1>, scalar_prefetch = 0 : i64, scratch_operands = 0 : i64, tpu.core_type = #tpu.core_type<tc>, window_params = [{transform_indices = @transform_0, window_bounds = array<i64: 16>}, {transform_indices = @transform_1, window_bounds = array<i64: 16, 1, 128>}, {pipeline_mode = #tpu.pipeline_mode<synchronous>, transform_indices = @transform_2, window_bounds = array<i64: 1, 128>}, {transform_indices = @transform_3, window_bounds = array<i64: 1, 128>}]} {
    %c0 = arith.constant 0 : index
    %c0_0 = arith.constant 0 : index
    %c0_1 = arith.constant 0 : index
    %0 = vector.load %arg2[%c0, %c0_0, %c0_1] : memref<16x1x128xf32, #tpu.memory_space<vmem>>, vector<1x1x128xf32>
    %1 = vector.shape_cast %0 : vector<1x1x128xf32> to vector<1x128xf32>
    %c0_2 = arith.constant 0 : index
    %2 = memref.load %arg1[%c0_2] : memref<16xf32, #tpu.memory_space<smem>>
    %3 = vector.broadcast %2 : f32 to vector<1x128xf32>
    %4 = arith.mulf %1, %3 : vector<1x128xf32>
    %c1 = arith.constant 1 : index
    %c0_3 = arith.constant 0 : index
    %c0_4 = arith.constant 0 : index
    %5 = vector.load %arg2[%c1, %c0_3, %c0_4] : memref<16x1x128xf32, #tpu.memory_space<vmem>>, vector<1x1x128xf32>
    %6 = vector.shape_cast %5 : vector<1x1x128xf32> to vector<1x128xf32>
    %c1_5 = arith.constant 1 : index
    %7 = memref.load %arg1[%c1_5] : memref<16xf32, #tpu.memory_space<smem>>
    %8 = vector.broadcast %7 : f32 to vector<1x128xf32>
    %9 = arith.mulf %6, %8 : vector<1x128xf32>
    %10 = arith.addf %4, %9 : vector<1x128xf32>
    %c2 = arith.constant 2 : index
    %c0_6 = arith.constant 0 : index
    %c0_7 = arith.constant 0 : index
    %11 = vector.load %arg2[%c2, %c0_6, %c0_7] : memref<16x1x128xf32, #tpu.memory_space<vmem>>, vector<1x1x128xf32>
    %12 = vector.shape_cast %11 : vector<1x1x128xf32> to vector<1x128xf32>
    %c2_8 = arith.constant 2 : index
    %13 = memref.load %arg1[%c2_8] : memref<16xf32, #tpu.memory_space<smem>>
    %14 = vector.broadcast %13 : f32 to vector<1x128xf32>
    %15 = arith.mulf %12, %14 : vector<1x128xf32>
    %16 = arith.addf %10, %15 : vector<1x128xf32>
    %c3 = arith.constant 3 : index
    %c0_9 = arith.constant 0 : index
    %c0_10 = arith.constant 0 : index
    %17 = vector.load %arg2[%c3, %c0_9, %c0_10] : memref<16x1x128xf32, #tpu.memory_space<vmem>>, vector<1x1x128xf32>
    %18 = vector.shape_cast %17 : vector<1x1x128xf32> to vector<1x128xf32>
    %c3_11 = arith.constant 3 : index
    %19 = memref.load %arg1[%c3_11] : memref<16xf32, #tpu.memory_space<smem>>
    %20 = vector.broadcast %19 : f32 to vector<1x128xf32>
    %21 = arith.mulf %18, %20 : vector<1x128xf32>
    %22 = arith.addf %16, %21 : vector<1x128xf32>
    %c4 = arith.constant 4 : index
    %c0_12 = arith.constant 0 : index
    %c0_13 = arith.constant 0 : index
    %23 = vector.load %arg2[%c4, %c0_12, %c0_13] : memref<16x1x128xf32, #tpu.memory_space<vmem>>, vector<1x1x128xf32>
    %24 = vector.shape_cast %23 : vector<1x1x128xf32> to vector<1x128xf32>
    %c4_14 = arith.constant 4 : index
    %25 = memref.load %arg1[%c4_14] : memref<16xf32, #tpu.memory_space<smem>>
    %26 = vector.broadcast %25 : f32 to vector<1x128xf32>
    %27 = arith.mulf %24, %26 : vector<1x128xf32>
    %28 = arith.addf %22, %27 : vector<1x128xf32>
    %c5 = arith.constant 5 : index
    %c0_15 = arith.constant 0 : index
    %c0_16 = arith.constant 0 : index
    %29 = vector.load %arg2[%c5, %c0_15, %c0_16] : memref<16x1x128xf32, #tpu.memory_space<vmem>>, vector<1x1x128xf32>
    %30 = vector.shape_cast %29 : vector<1x1x128xf32> to vector<1x128xf32>
    %c5_17 = arith.constant 5 : index
    %31 = memref.load %arg1[%c5_17] : memref<16xf32, #tpu.memory_space<smem>>
    %32 = vector.broadcast %31 : f32 to vector<1x128xf32>
    %33 = arith.mulf %30, %32 : vector<1x128xf32>
    %34 = arith.addf %28, %33 : vector<1x128xf32>
    %c6 = arith.constant 6 : index
    %c0_18 = arith.constant 0 : index
    %c0_19 = arith.constant 0 : index
    %35 = vector.load %arg2[%c6, %c0_18, %c0_19] : memref<16x1x128xf32, #tpu.memory_space<vmem>>, vector<1x1x128xf32>
    %36 = vector.shape_cast %35 : vector<1x1x128xf32> to vector<1x128xf32>
    %c6_20 = arith.constant 6 : index
    %37 = memref.load %arg1[%c6_20] : memref<16xf32, #tpu.memory_space<smem>>
    %38 = vector.broadcast %37 : f32 to vector<1x128xf32>
    %39 = arith.mulf %36, %38 : vector<1x128xf32>
    %40 = arith.addf %34, %39 : vector<1x128xf32>
    %c7 = arith.constant 7 : index
    %c0_21 = arith.constant 0 : index
    %c0_22 = arith.constant 0 : index
    %41 = vector.load %arg2[%c7, %c0_21, %c0_22] : memref<16x1x128xf32, #tpu.memory_space<vmem>>, vector<1x1x128xf32>
    %42 = vector.shape_cast %41 : vector<1x1x128xf32> to vector<1x128xf32>
    %c7_23 = arith.constant 7 : index
    %43 = memref.load %arg1[%c7_23] : memref<16xf32, #tpu.memory_space<smem>>
    %44 = vector.broadcast %43 : f32 to vector<1x128xf32>
    %45 = arith.mulf %42, %44 : vector<1x128xf32>
    %46 = arith.addf %40, %45 : vector<1x128xf32>
    %c8 = arith.constant 8 : index
    %c0_24 = arith.constant 0 : index
    %c0_25 = arith.constant 0 : index
    %47 = vector.load %arg2[%c8, %c0_24, %c0_25] : memref<16x1x128xf32, #tpu.memory_space<vmem>>, vector<1x1x128xf32>
    %48 = vector.shape_cast %47 : vector<1x1x128xf32> to vector<1x128xf32>
    %c8_26 = arith.constant 8 : index
    %49 = memref.load %arg1[%c8_26] : memref<16xf32, #tpu.memory_space<smem>>
    %50 = vector.broadcast %49 : f32 to vector<1x128xf32>
    %51 = arith.mulf %48, %50 : vector<1x128xf32>
    %52 = arith.addf %46, %51 : vector<1x128xf32>
    %c9 = arith.constant 9 : index
    %c0_27 = arith.constant 0 : index
    %c0_28 = arith.constant 0 : index
    %53 = vector.load %arg2[%c9, %c0_27, %c0_28] : memref<16x1x128xf32, #tpu.memory_space<vmem>>, vector<1x1x128xf32>
    %54 = vector.shape_cast %53 : vector<1x1x128xf32> to vector<1x128xf32>
    %c9_29 = arith.constant 9 : index
    %55 = memref.load %arg1[%c9_29] : memref<16xf32, #tpu.memory_space<smem>>
    %56 = vector.broadcast %55 : f32 to vector<1x128xf32>
    %57 = arith.mulf %54, %56 : vector<1x128xf32>
    %58 = arith.addf %52, %57 : vector<1x128xf32>
    %c10 = arith.constant 10 : index
    %c0_30 = arith.constant 0 : index
    %c0_31 = arith.constant 0 : index
    %59 = vector.load %arg2[%c10, %c0_30, %c0_31] : memref<16x1x128xf32, #tpu.memory_space<vmem>>, vector<1x1x128xf32>
    %60 = vector.shape_cast %59 : vector<1x1x128xf32> to vector<1x128xf32>
    %c10_32 = arith.constant 10 : index
    %61 = memref.load %arg1[%c10_32] : memref<16xf32, #tpu.memory_space<smem>>
    %62 = vector.broadcast %61 : f32 to vector<1x128xf32>
    %63 = arith.mulf %60, %62 : vector<1x128xf32>
    %64 = arith.addf %58, %63 : vector<1x128xf32>
    %c11 = arith.constant 11 : index
    %c0_33 = arith.constant 0 : index
    %c0_34 = arith.constant 0 : index
    %65 = vector.load %arg2[%c11, %c0_33, %c0_34] : memref<16x1x128xf32, #tpu.memory_space<vmem>>, vector<1x1x128xf32>
    %66 = vector.shape_cast %65 : vector<1x1x128xf32> to vector<1x128xf32>
    %c11_35 = arith.constant 11 : index
    %67 = memref.load %arg1[%c11_35] : memref<16xf32, #tpu.memory_space<smem>>
    %68 = vector.broadcast %67 : f32 to vector<1x128xf32>
    %69 = arith.mulf %66, %68 : vector<1x128xf32>
    %70 = arith.addf %64, %69 : vector<1x128xf32>
    %c12 = arith.constant 12 : index
    %c0_36 = arith.constant 0 : index
    %c0_37 = arith.constant 0 : index
    %71 = vector.load %arg2[%c12, %c0_36, %c0_37] : memref<16x1x128xf32, #tpu.memory_space<vmem>>, vector<1x1x128xf32>
    %72 = vector.shape_cast %71 : vector<1x1x128xf32> to vector<1x128xf32>
    %c12_38 = arith.constant 12 : index
    %73 = memref.load %arg1[%c12_38] : memref<16xf32, #tpu.memory_space<smem>>
    %74 = vector.broadcast %73 : f32 to vector<1x128xf32>
    %75 = arith.mulf %72, %74 : vector<1x128xf32>
    %76 = arith.addf %70, %75 : vector<1x128xf32>
    %c13 = arith.constant 13 : index
    %c0_39 = arith.constant 0 : index
    %c0_40 = arith.constant 0 : index
    %77 = vector.load %arg2[%c13, %c0_39, %c0_40] : memref<16x1x128xf32, #tpu.memory_space<vmem>>, vector<1x1x128xf32>
    %78 = vector.shape_cast %77 : vector<1x1x128xf32> to vector<1x128xf32>
    %c13_41 = arith.constant 13 : index
    %79 = memref.load %arg1[%c13_41] : memref<16xf32, #tpu.memory_space<smem>>
    %80 = vector.broadcast %79 : f32 to vector<1x128xf32>
    %81 = arith.mulf %78, %80 : vector<1x128xf32>
    %82 = arith.addf %76, %81 : vector<1x128xf32>
    %c14 = arith.constant 14 : index
    %c0_42 = arith.constant 0 : index
    %c0_43 = arith.constant 0 : index
    %83 = vector.load %arg2[%c14, %c0_42, %c0_43] : memref<16x1x128xf32, #tpu.memory_space<vmem>>, vector<1x1x128xf32>
    %84 = vector.shape_cast %83 : vector<1x1x128xf32> to vector<1x128xf32>
    %c14_44 = arith.constant 14 : index
    %85 = memref.load %arg1[%c14_44] : memref<16xf32, #tpu.memory_space<smem>>
    %86 = vector.broadcast %85 : f32 to vector<1x128xf32>
    %87 = arith.mulf %84, %86 : vector<1x128xf32>
    %88 = arith.addf %82, %87 : vector<1x128xf32>
    %c15 = arith.constant 15 : index
    %c0_45 = arith.constant 0 : index
    %c0_46 = arith.constant 0 : index
    %89 = vector.load %arg2[%c15, %c0_45, %c0_46] : memref<16x1x128xf32, #tpu.memory_space<vmem>>, vector<1x1x128xf32>
    %90 = vector.shape_cast %89 : vector<1x1x128xf32> to vector<1x128xf32>
    %c15_47 = arith.constant 15 : index
    %91 = memref.load %arg1[%c15_47] : memref<16xf32, #tpu.memory_space<smem>>
    %92 = vector.broadcast %91 : f32 to vector<1x128xf32>
    %93 = arith.mulf %90, %92 : vector<1x128xf32>
    %94 = arith.addf %88, %93 : vector<1x128xf32>
    %c0_48 = arith.constant 0 : index
    %c0_49 = arith.constant 0 : index
    %95 = vector.load %arg3[%c0_48, %c0_49] : memref<1x128xf32, #tpu.memory_space<vmem>>, vector<1x128xf32>
    %96 = arith.addf %94, %95 : vector<1x128xf32>
    %cst = arith.constant 0.000000e+00 : f32
    %97 = vector.broadcast %cst : f32 to vector<1x128xf32>
    %98 = arith.maximumf %96, %97 : vector<1x128xf32>
    %c0_50 = arith.constant 0 : index
    %c0_51 = arith.constant 0 : index
    %99 = vector.load %arg4[%c0_50, %c0_51] : memref<1x128xf32, #tpu.memory_space<vmem>>, vector<1x128xf32>
    tpu.vector_store %arg4[%c0_50, %c0_51], %98 {strides = array<i32>} : memref<1x128xf32, #tpu.memory_space<vmem>>, vector<1x128xf32>,
    return
  }
  func.func @transform_0(%arg0: i32) -> i32 {
    %c0_i32 = arith.constant 0 : i32
    %c0_i32_0 = arith.constant 0 : i32
    return %c0_i32 : i32
  }
  func.func @transform_1(%arg0: i32) -> (i32, i32, i32) {
    %c0_i32 = arith.constant 0 : i32
    %c0_i32_0 = arith.constant 0 : i32
    %c0_i32_1 = arith.constant 0 : i32
    return %c0_i32, %arg0, %c0_i32_0 : i32, i32, i32
  }
  func.func @transform_2(%arg0: i32) -> (i32, i32) {
    %c0_i32 = arith.constant 0 : i32
    %c0_i32_0 = arith.constant 0 : i32
    %c0_i32_1 = arith.constant 0 : i32
    return %c0_i32, %c0_i32_0 : i32, i32
  }
  func.func @transform_3(%arg0: i32) -> (i32, i32) {
    %c0_i32 = arith.constant 0 : i32
    %c0_i32_0 = arith.constant 0 : i32
    return %arg0, %c0_i32 : i32, i32
  }
}

</mosaic_0001>

<bundles_post_ra>
// kernel: model_forward.1
= control target key start
LH: loop header
LB: loop body
LE: loop exit
PB: predicated region body
PF: predicated region fallthrough
CT: control target
= control target key end

     0   :  { %8 = vsyncpa [#allocation3], 0  ;;  %s253_s0 = inlined_call_operand.vmem [shape: f32[16], index: 0, kind: input, shape index: {}]   ;;  %s254_s1 = inlined_call_operand.vmem [shape: f32[16,1,128], index: 1, kind: input, shape index: {}]   ;;  %s255_s2 = inlined_call_operand.vmem [shape: f32[1,128], index: 2, kind: input, shape index: {}]   ;;  %s256_s3 = inlined_call_operand.vmem [shape: f32[1,128], index: 3, kind: output, shape index: {}]  }
   0x1   :  { %s15_s14 = sshll.u32 %s253_s0, 4  ;;  %s16_s14 = int_to_ptr.vmem [resolvable:$true] %s15_s14 }
   0x2   :  { %s161_s15 = scalar_lea.vmem %s16_s14, 16  ;;  %p166_p1 = scmp.lt.s32.totalorder %s16_s14, %s16_s14 }
   0x3   :  { %p162_p0 = scmp.ne.s32.totalorder %s16_s14, %s161_s15  ;;  %p167_p2 = scmp.lt.s32.totalorder %s161_s15, %s161_s15 }
   0x5   :  { %p168_p3 = por %p167_p2, %p166_p1 }
   0x7   :  { %p169_p4 = pnand %p168_p3, %p162_p0 }
   0x9   :  { %172 = shalt.err (!%p169_p4)
}
   0xa   :  { %s175_s16 = smov [#allocation2]  }
   0xb   :  { %18 = dma.vmem_to_smem %s16_s14, 16, %s175_s16, [#allocation3]  }
   0xc   :  { %173 = dma.done.wait [#allocation3], 16  }
   0xd   :  { %174 = vsyncadd [#allocation3], 4294967280 }
   0xe   :  { %26 = sfence }
   0xf   :  { %s28_s17 = sld [smem:[#allocation2]]  ;;  %s131_s18 = sld [smem:[#allocation2 + $0x1]]  ;;  %v27_v0 = vld [vmem:[%s254_s1] sm:$0x1]  ;;  %v130_v1 = vld [vmem:[%s254_s1 + $0x1] sm:$0x1] }
  0x10   :  { %s133_s19 = sld [smem:[#allocation2 + $0x2]]  ;;  %s135_s20 = sld [smem:[#allocation2 + $0x3]]  ;;  %v132_v2 = vld [vmem:[%s254_s1 + $0x2] sm:$0x1]  ;;  %v134_v7 = vld [vmem:[%s254_s1 + $0x3] sm:$0x1] }
  0x11   :  { %s137_s21 = sld [smem:[#allocation2 + $0x4]]  ;;  %s139_s22 = sld [smem:[#allocation2 + $0x5]]  ;;  %v136_v11 = vld [vmem:[%s254_s1 + $0x4] sm:$0x1]  ;;  %v138_v15 = vld [vmem:[%s254_s1 + $0x5] sm:$0x1] }
  0x12   :  { %s141_s28 = sld [smem:[#allocation2 + $0x6]]  ;;  %s143_s4 = sld [smem:[#allocation2 + $0x7]]  ;;  %v140_v19 = vld [vmem:[%s254_s1 + $0x6] sm:$0x1]  ;;  %v142_v23 = vld [vmem:[%s254_s1 + $0x7] sm:$0x1] }
  0x13   :  { %s145_s7 = sld [smem:[#allocation2 + $0x8]]  ;;  %s147_s10 = sld [smem:[#allocation2 + $0x9]]  ;;  %v144_v27 = vld [vmem:[%s254_s1 + $0x8] sm:$0x1]  ;;  %v146_v31 = vld [vmem:[%s254_s1 + $0x9] sm:$0x1] }
  0x14   :  { %s149_s13 = sld [smem:[#allocation2 + $0xa]]  ;;  %s151_s16 = sld [smem:[#allocation2 + $0xb]]  ;;  %v148_v35 = vld [vmem:[%s254_s1 + $0xa] sm:$0x1]  ;;  %v150_v39 = vld [vmem:[%s254_s1 + $0xb] sm:$0x1] }
  0x15   :  { %v29_v3 = vstv %s28_s17  ;;  %v34_v5 = vstv %s131_s18  ;;  %s157_s24 = sld [smem:[#allocation2 + $0xe]]  ;;  %s159_s27 = sld [smem:[#allocation2 + $0xf]]  ;;  %v152_v43 = vld [vmem:[%s254_s1 + $0xc] sm:$0x1]  ;;  %v154_v47 = vld [vmem:[%s254_s1 + $0xd] sm:$0x1] }
  0x16   :  { %v30_v4 = vmul.f32 %v29_v3, %v27_v0  ;;  %v40_v6 = vstv %s133_s19  ;;  %v35_v8 = vmul.f32 %v130_v1, %v34_v5  ;;  %v46_v10 = vstv %s135_s20  ;;  %s153_s19 = sld [smem:[#allocation2 + $0xc]]  ;;  %v156_v51 = vld [vmem:[%s254_s1 + $0xe] sm:$0x1]  ;;  %v158_v55 = vld [vmem:[%s254_s1 + $0xf] sm:$0x1] }
  0x17   :  { %v41_v9 = vmul.f32 %v132_v2, %v40_v6  ;;  %v52_v12 = vstv %s137_s21  ;;  %v47_v14 = vmul.f32 %v134_v7, %v46_v10  ;;  %v58_v16 = vstv %s139_s22  ;;  %s155_s22 = sld [smem:[#allocation2 + $0xd]]  ;;  %v121_v62 = vld [vmem:[%s255_s2] sm:$0x1] }
  0x18   :  { %v36_v13 = vadd.f32 %v35_v8, %v30_v4  ;;  %v53_v18 = vmul.f32 %v136_v11, %v52_v12  ;;  %v64_v20 = vstv %s141_s28  ;;  %v59_v22 = vmul.f32 %v138_v15, %v58_v16 }
  0x19   :  { %v70_v24 = vstv %s143_s4  ;;  %v65_v26 = vmul.f32 %v140_v19, %v64_v20  ;;  %v76_v28 = vstv %s145_s7  ;;  %v82_v32 = vstv %s147_s10 }
  0x1a   :  { %v42_v17 = vadd.f32 %v41_v9, %v36_v13  ;;  %v71_v30 = vmul.f32 %v142_v23, %v70_v24  ;;  %v77_v34 = vmul.f32 %v144_v27, %v76_v28  ;;  %v88_v36 = vstv %s149_s13 }
  0x1b   :  { %v83_v38 = vmul.f32 %v146_v31, %v82_v32  ;;  %v94_v40 = vstv %s151_s16  ;;  %v89_v42 = vmul.f32 %v148_v35, %v88_v36  ;;  %v112_v52 = vstv %s157_s24 }
  0x1c   :  { %v48_v21 = vadd.f32 %v47_v14, %v42_v17  ;;  %v100_v44 = vstv %s153_s19  ;;  %v95_v46 = vmul.f32 %v150_v39, %v94_v40  ;;  %v118_v56 = vstv %s159_s27 }
  0x1d   :  { %v106_v48 = vstv %s155_s22  ;;  %v101_v50 = vmul.f32 %v152_v43, %v100_v44  ;;  %v113_v58 = vmul.f32 %v156_v51, %v112_v52  ;;  %v119_v60 = vmul.f32 %v158_v55, %v118_v56 }
  0x1e   :  { %v54_v25 = vadd.f32 %v53_v18, %v48_v21  ;;  %v107_v54 = vmul.f32 %v154_v47, %v106_v48 }
  0x20   :  { %v60_v29 = vadd.f32 %v59_v22, %v54_v25 }
  0x22   :  { %v66_v33 = vadd.f32 %v65_v26, %v60_v29 }
  0x24   :  { %v72_v37 = vadd.f32 %v71_v30, %v66_v33 }
  0x26   :  { %v78_v41 = vadd.f32 %v77_v34, %v72_v37 }
  0x28   :  { %v84_v45 = vadd.f32 %v83_v38, %v78_v41 }
  0x2a   :  { %v90_v49 = vadd.f32 %v89_v42, %v84_v45 }
  0x2c   :  { %v96_v53 = vadd.f32 %v95_v46, %v90_v49 }
  0x2e   :  { %v102_v57 = vadd.f32 %v101_v50, %v96_v53 }
  0x30   :  { %v108_v59 = vadd.f32 %v107_v54, %v102_v57 }
  0x32   :  { %v114_v61 = vadd.f32 %v113_v58, %v108_v59 }
  0x34   :  { %v120_v63 = vadd.f32 %v119_v60, %v114_v61 }
  0x36   :  { %v122_v0 = vadd.f32 %v121_v62, %v120_v63 }
  0x38   :  { %v123_v1 = vmax.f32 %v122_v0, 0.0 }
  0x3a   :  { %124 = vst [vmem:[%s256_s3] sm:$0x1] %v123_v1 }
  0x3b   :  { %129 = vsyncpa [#allocation3], 1 }

</bundles_post_ra>
